<compile_context>
chip_gen: v5e
topology: v5e:2x2
jax: 0.10.0
libtpu: 0.0.40
codegen_flags: <defaults>
</compile_context>

<pallas_src>
import functools

import jax
import jax.numpy as jnp
from jax.experimental import pallas as pl
from jax.experimental.pallas import tpu as pltpu

LANE = 128


# ----------------------------------------------------------------------------
# Pallas kernel: hinge-fern evaluation for one (sample, spatial tile).
# ----------------------------------------------------------------------------
def _hinge_fern_kernel(x_ref, sel_ref, thr_ref, w_ref, out_ref, *,
                       depth, n_trees, n_leaves):
    # x_ref:   [Cimg, TILE]   image features (channels on sublanes, pixels on lanes)
    # sel_ref: [D*T, Cimg]    one-hot img-channel selection (rows for vec ordinals = 0)
    # thr_ref: [D*T, 1]       per-sample effective thresholds (vec term folded in)
    # w_ref:   [T, L]         leaf weights
    # out_ref: [T, TILE]
    T = n_trees

    # Single fused MXU matmul gathers the selected image channel for every (depth, tree).
    g = jnp.dot(sel_ref[...], x_ref[...],
                preferred_element_type=jnp.float32)            # [D*T, TILE]
    margins = g - thr_ref[...]                                 # [D*T, TILE] (lane broadcast)

    bits = []
    minabs = None
    for d in range(depth):                                     # static, small
        m_d = margins[d * T:(d + 1) * T, :]                    # [T, TILE]
        bits.append(m_d > 0.0)                                 # keep as bool masks
        a = jnp.abs(m_d)
        minabs = a if minabs is None else jnp.minimum(minabs, a)

    # Binary-tree leaf-weight select: L-1 selects, no key materialization.
    w = w_ref[...]                                             # [T, L]
    cands = [w[:, l:l + 1] for l in range(n_leaves)]           # each [T, 1]
    for d in range(depth):
        b = bits[d]
        cands = [jnp.where(b, cands[2 * j + 1], cands[2 * j])
                 for j in range(len(cands) // 2)]
    w_sel = cands[0]                                           # [T, TILE]

    out_ref[...] = (minabs * w_sel).astype(out_ref.dtype)


# ----------------------------------------------------------------------------
# Wrapper: parameter repacking (glue) + pallas_call.
# ----------------------------------------------------------------------------
def hinge_fern_fusion(img, vec, thresholds, ordinals, weights, *, tile_hw_max=1024):
    N, Cimg, H, W = img.shape
    Cvec = vec.shape[1]
    T, D = thresholds.shape
    L = weights.shape[1]
    assert L == 2 ** D
    DT = D * T
    HW = H * W

    # ---- host-side parameter repacking (tiny, not the hot path) -------------
    flat_ord = ordinals.T.reshape(DT)                          # row r = d*T + t -> ordinals[t, d]
    is_img = flat_ord < Cimg
    sel_img = (flat_ord[:, None] ==
               jnp.arange(Cimg, dtype=flat_ord.dtype)[None, :]).astype(jnp.float32)   # [DT, Cimg]

    # Fold the per-sample vec contribution into effective thresholds:
    #   margin = img·sel_img - (thresholds - vec·sel_vec)
    vec_idx = jnp.clip(flat_ord - Cimg, 0, Cvec - 1)
    vec_gather = vec.astype(jnp.float32)[:, vec_idx]           # [N, DT]
    vec_contrib = jnp.where(is_img[None, :], 0.0, vec_gather)  # [N, DT]
    thr_flat = thresholds.T.reshape(DT).astype(jnp.float32)    # [DT]
    thr_eff = (thr_flat[None, :] - vec_contrib)[:, :, None]    # [N, DT, 1]

    weights_f = weights.astype(jnp.float32)                    # [T, L]

    # ---- image: keep NCHW, just flatten the spatial dims (free reshape) -----
    img_flat = img.reshape(N, Cimg, HW).astype(jnp.float32)    # [N, Cimg, HW]
    tile_hw = max(LANE, min(tile_hw_max, ((HW + LANE - 1) // LANE) * LANE))
    tile_hw = (tile_hw // LANE) * LANE                         # multiple of 128
    hw_pad = ((HW + tile_hw - 1) // tile_hw) * tile_hw
    if hw_pad != HW:
        img_flat = jnp.pad(img_flat, ((0, 0), (0, 0), (0, hw_pad - HW)))

    grid = (N, hw_pad // tile_hw)
    kernel = functools.partial(_hinge_fern_kernel, depth=D, n_trees=T, n_leaves=L)

    out_flat = pl.pallas_call(
        kernel,
        out_shape=jax.ShapeDtypeStruct((N, T, hw_pad), jnp.float32),
        grid_spec=pltpu.PrefetchScalarGridSpec(
            num_scalar_prefetch=0,
            grid=grid,
            in_specs=[
                pl.BlockSpec((None, Cimg, tile_hw), lambda b, j: (b, 0, j)),   # img tile
                pl.BlockSpec((DT, Cimg), lambda b, j: (0, 0)),                 # sel (full)
                pl.BlockSpec((None, DT, 1), lambda b, j: (b, 0, 0)),           # thr_eff (per batch)
                pl.BlockSpec((T, L), lambda b, j: (0, 0)),                     # leaf weights (full)
            ],
            out_specs=pl.BlockSpec((None, T, tile_hw), lambda b, j: (b, 0, j)),
        ),
        compiler_params=pltpu.CompilerParams(
            dimension_semantics=("parallel", "parallel")),
    )(img_flat, sel_img, thr_eff, weights_f)

    # Output is already NCHW-ordered: just drop the spatial padding and reshape.
    return out_flat[:, :, :HW].reshape(N, T, H, W)


# ----------------------------------------------------------------------------
# Pure-JAX reference for validation.
# ----------------------------------------------------------------------------
def reference(img, vec, thresholds, ordinals, weights):
    N, Cimg, H, W = img.shape
    Cvec = vec.shape[1]
    T, D = thresholds.shape
    f_img = jnp.transpose(img, (0, 2, 3, 1)).reshape(N * H * W, Cimg)
    f_vec = jnp.broadcast_to(vec[:, None, :], (N, H * W, Cvec)).reshape(N * H * W, Cvec)
    F = jnp.concatenate([f_img, f_vec], axis=1)
    gathered = F[:, ordinals.reshape(-1)].reshape(-1, T, D)                 # [P, T, D]
    margins = gathered - thresholds[None, :, :]
    bits = (margins > 0).astype(jnp.int32)
    key = jnp.sum(bits * (2 ** jnp.arange(D, dtype=jnp.int32))[None, None, :], axis=-1)
    minabs = jnp.min(jnp.abs(margins), axis=-1)                             # [P, T]
    w_sel = weights[jnp.arange(T)[None, :], key]                            # [P, T]
    z = minabs * w_sel
    return jnp.transpose(z.reshape(N, H, W, T), (0, 3, 1, 2))               # [N, T, H, W]


if __name__ == "__main__":
    # Small shapes consistent with the module's forward.
    N, Cimg, Cvec, H, W = 2, 4, 4, 8, 8
    out_channels, depth = 16, 4          # number of ferns / decisions per fern
    n_leaves = 2 ** depth
    in_channels = Cimg + Cvec

    keys = jax.random.split(jax.random.PRNGKey(0), 6)
    img = jax.random.normal(keys[0], (N, Cimg, H, W), jnp.float32)
    vec = jax.random.normal(keys[1], (N, Cvec), jnp.float32)

    # Deterministic parameter init mirroring __init__ shapes/distributions.
    thresholds = 6.0 * jax.random.uniform(keys[2], (out_channels, depth), jnp.float32) - 3.0
    # init_type='balanced_random' with p=0.5 and equal img/vec channel counts
    # reduces to uniform sampling over in_channels.
    ordinals = jax.random.randint(keys[3], (out_channels, depth), 0, in_channels, jnp.int32)
    weights = jax.random.normal(keys[4], (out_channels, n_leaves), jnp.float32)
    # TODO(synk): HingeFern.fix_thresholds is an init-time parameter repair; it does not
    # change forward semantics for already-valid random parameters, so it is not replicated.

    out = hinge_fern_fusion(img, vec, thresholds, ordinals, weights)
    out = jax.block_until_ready(out)

    ref = reference(img, vec, thresholds, ordinals, weights)
    assert out.shape == (N, out_channels, H, W)
    err = float(jnp.max(jnp.abs(out - ref)))
    assert jnp.allclose(out, ref, atol=1e-5, rtol=1e-5), err

    print("KERNEL_OK")
</pallas_src>

<mosaic_0001>
module attributes {stable_mosaic.version = 11 : i64} {
  func.func @_hinge_fern_kernel(%arg0: i32, %arg1: i32, %arg2: memref<1x4x128xf32, #tpu.memory_space<vmem>>, %arg3: memref<64x4xf32, #tpu.memory_space<vmem>>, %arg4: memref<1x64x1xf32, #tpu.memory_space<vmem>>, %arg5: memref<16x16xf32, #tpu.memory_space<vmem>>, %arg6: memref<1x16x128xf32, #tpu.memory_space<vmem>>) attributes {dimension_semantics = [#tpu.dimension_semantics<parallel>, #tpu.dimension_semantics<parallel>], iteration_bounds = array<i64: 2, 1>, scalar_prefetch = 0 : i64, scratch_operands = 0 : i64, tpu.core_type = #tpu.core_type<tc>, window_params = [{transform_indices = @transform_0, window_bounds = array<i64: 1, 4, 128>}, {pipeline_mode = #tpu.pipeline_mode<synchronous>, transform_indices = @transform_1, window_bounds = array<i64: 64, 4>}, {transform_indices = @transform_2, window_bounds = array<i64: 1, 64, 1>}, {pipeline_mode = #tpu.pipeline_mode<synchronous>, transform_indices = @transform_3, window_bounds = array<i64: 16, 16>}, {transform_indices = @transform_4, window_bounds = array<i64: 1, 16, 128>}]} {
    %c0 = arith.constant 0 : index
    %c0_0 = arith.constant 0 : index
    %0 = vector.load %arg3[%c0, %c0_0] : memref<64x4xf32, #tpu.memory_space<vmem>>, vector<64x4xf32>
    %c0_1 = arith.constant 0 : index
    %c0_2 = arith.constant 0 : index
    %c0_3 = arith.constant 0 : index
    %1 = vector.load %arg2[%c0_1, %c0_2, %c0_3] : memref<1x4x128xf32, #tpu.memory_space<vmem>>, vector<1x4x128xf32>
    %2 = vector.shape_cast %1 : vector<1x4x128xf32> to vector<4x128xf32>
    %cst = arith.constant dense<0.000000e+00> : vector<64x128xf32>
    %3 = tpu.matmul %0, %2, %cst {dimension_numbers = #tpu.dot_dimension_numbers<[1], [0], [0], [1], [0, 0, 1, 1], [], []>} : vector<64x4xf32>, vector<4x128xf32>, vector<64x128xf32> -> vector<64x128xf32>
    %c0_4 = arith.constant 0 : index
    %c0_5 = arith.constant 0 : index
    %c0_6 = arith.constant 0 : index
    %4 = vector.load %arg4[%c0_4, %c0_5, %c0_6] : memref<1x64x1xf32, #tpu.memory_space<vmem>>, vector<1x64x1xf32>
    %5 = vector.shape_cast %4 : vector<1x64x1xf32> to vector<64x1xf32>
    %6 = vector.broadcast %5 : vector<64x1xf32> to vector<64x128xf32>
    %7 = arith.subf %3, %6 : vector<64x128xf32>
    %8 = vector.extract_strided_slice %7 {offsets = [0, 0], sizes = [16, 128], strides = [1, 1]} : vector<64x128xf32> to vector<16x128xf32>
    %cst_7 = arith.constant 0.000000e+00 : f32
    %9 = vector.broadcast %cst_7 : f32 to vector<16x128xf32>
    %10 = arith.cmpf ogt, %8, %9 : vector<16x128xf32>
    %11 = math.absf %8 : vector<16x128xf32>
    %12 = vector.extract_strided_slice %7 {offsets = [16, 0], sizes = [16, 128], strides = [1, 1]} : vector<64x128xf32> to vector<16x128xf32>
    %cst_8 = arith.constant 0.000000e+00 : f32
    %13 = vector.broadcast %cst_8 : f32 to vector<16x128xf32>
    %14 = arith.cmpf ogt, %12, %13 : vector<16x128xf32>
    %15 = math.absf %12 : vector<16x128xf32>
    %16 = arith.minimumf %11, %15 : vector<16x128xf32>
    %17 = vector.extract_strided_slice %7 {offsets = [32, 0], sizes = [16, 128], strides = [1, 1]} : vector<64x128xf32> to vector<16x128xf32>
    %cst_9 = arith.constant 0.000000e+00 : f32
    %18 = vector.broadcast %cst_9 : f32 to vector<16x128xf32>
    %19 = arith.cmpf ogt, %17, %18 : vector<16x128xf32>
    %20 = math.absf %17 : vector<16x128xf32>
    %21 = arith.minimumf %16, %20 : vector<16x128xf32>
    %22 = vector.extract_strided_slice %7 {offsets = [48, 0], sizes = [16, 128], strides = [1, 1]} : vector<64x128xf32> to vector<16x128xf32>
    %cst_10 = arith.constant 0.000000e+00 : f32
    %23 = vector.broadcast %cst_10 : f32 to vector<16x128xf32>
    %24 = arith.cmpf ogt, %22, %23 : vector<16x128xf32>
    %25 = math.absf %22 : vector<16x128xf32>
    %26 = arith.minimumf %21, %25 : vector<16x128xf32>
    %c0_11 = arith.constant 0 : index
    %c0_12 = arith.constant 0 : index
    %27 = vector.load %arg5[%c0_11, %c0_12] : memref<16x16xf32, #tpu.memory_space<vmem>>, vector<16x16xf32>
    %28 = vector.extract_strided_slice %27 {offsets = [0, 0], sizes = [16, 1], strides = [1, 1]} : vector<16x16xf32> to vector<16x1xf32>
    %29 = vector.extract_strided_slice %27 {offsets = [0, 1], sizes = [16, 1], strides = [1, 1]} : vector<16x16xf32> to vector<16x1xf32>
    %30 = vector.extract_strided_slice %27 {offsets = [0, 2], sizes = [16, 1], strides = [1, 1]} : vector<16x16xf32> to vector<16x1xf32>
    %31 = vector.extract_strided_slice %27 {offsets = [0, 3], sizes = [16, 1], strides = [1, 1]} : vector<16x16xf32> to vector<16x1xf32>
    %32 = vector.extract_strided_slice %27 {offsets = [0, 4], sizes = [16, 1], strides = [1, 1]} : vector<16x16xf32> to vector<16x1xf32>
    %33 = vector.extract_strided_slice %27 {offsets = [0, 5], sizes = [16, 1], strides = [1, 1]} : vector<16x16xf32> to vector<16x1xf32>
    %34 = vector.extract_strided_slice %27 {offsets = [0, 6], sizes = [16, 1], strides = [1, 1]} : vector<16x16xf32> to vector<16x1xf32>
    %35 = vector.extract_strided_slice %27 {offsets = [0, 7], sizes = [16, 1], strides = [1, 1]} : vector<16x16xf32> to vector<16x1xf32>
    %36 = vector.extract_strided_slice %27 {offsets = [0, 8], sizes = [16, 1], strides = [1, 1]} : vector<16x16xf32> to vector<16x1xf32>
    %37 = vector.extract_strided_slice %27 {offsets = [0, 9], sizes = [16, 1], strides = [1, 1]} : vector<16x16xf32> to vector<16x1xf32>
    %38 = vector.extract_strided_slice %27 {offsets = [0, 10], sizes = [16, 1], strides = [1, 1]} : vector<16x16xf32> to vector<16x1xf32>
    %39 = vector.extract_strided_slice %27 {offsets = [0, 11], sizes = [16, 1], strides = [1, 1]} : vector<16x16xf32> to vector<16x1xf32>
    %40 = vector.extract_strided_slice %27 {offsets = [0, 12], sizes = [16, 1], strides = [1, 1]} : vector<16x16xf32> to vector<16x1xf32>
    %41 = vector.extract_strided_slice %27 {offsets = [0, 13], sizes = [16, 1], strides = [1, 1]} : vector<16x16xf32> to vector<16x1xf32>
    %42 = vector.extract_strided_slice %27 {offsets = [0, 14], sizes = [16, 1], strides = [1, 1]} : vector<16x16xf32> to vector<16x1xf32>
    %43 = vector.extract_strided_slice %27 {offsets = [0, 15], sizes = [16, 1], strides = [1, 1]} : vector<16x16xf32> to vector<16x1xf32>
    %44 = vector.shape_cast %29 : vector<16x1xf32> to vector<16x1xf32>
    %45 = vector.broadcast %44 : vector<16x1xf32> to vector<16x128xf32>
    %46 = vector.shape_cast %28 : vector<16x1xf32> to vector<16x1xf32>
    %47 = vector.broadcast %46 : vector<16x1xf32> to vector<16x128xf32>
    %48 = arith.select %10, %45, %47 : vector<16x128xi1>, vector<16x128xf32>
    %49 = vector.shape_cast %31 : vector<16x1xf32> to vector<16x1xf32>
    %50 = vector.broadcast %49 : vector<16x1xf32> to vector<16x128xf32>
    %51 = vector.shape_cast %30 : vector<16x1xf32> to vector<16x1xf32>
    %52 = vector.broadcast %51 : vector<16x1xf32> to vector<16x128xf32>
    %53 = arith.select %10, %50, %52 : vector<16x128xi1>, vector<16x128xf32>
    %54 = vector.shape_cast %33 : vector<16x1xf32> to vector<16x1xf32>
    %55 = vector.broadcast %54 : vector<16x1xf32> to vector<16x128xf32>
    %56 = vector.shape_cast %32 : vector<16x1xf32> to vector<16x1xf32>
    %57 = vector.broadcast %56 : vector<16x1xf32> to vector<16x128xf32>
    %58 = arith.select %10, %55, %57 : vector<16x128xi1>, vector<16x128xf32>
    %59 = vector.shape_cast %35 : vector<16x1xf32> to vector<16x1xf32>
    %60 = vector.broadcast %59 : vector<16x1xf32> to vector<16x128xf32>
    %61 = vector.shape_cast %34 : vector<16x1xf32> to vector<16x1xf32>
    %62 = vector.broadcast %61 : vector<16x1xf32> to vector<16x128xf32>
    %63 = arith.select %10, %60, %62 : vector<16x128xi1>, vector<16x128xf32>
    %64 = vector.shape_cast %37 : vector<16x1xf32> to vector<16x1xf32>
    %65 = vector.broadcast %64 : vector<16x1xf32> to vector<16x128xf32>
    %66 = vector.shape_cast %36 : vector<16x1xf32> to vector<16x1xf32>
    %67 = vector.broadcast %66 : vector<16x1xf32> to vector<16x128xf32>
    %68 = arith.select %10, %65, %67 : vector<16x128xi1>, vector<16x128xf32>
    %69 = vector.shape_cast %39 : vector<16x1xf32> to vector<16x1xf32>
    %70 = vector.broadcast %69 : vector<16x1xf32> to vector<16x128xf32>
    %71 = vector.shape_cast %38 : vector<16x1xf32> to vector<16x1xf32>
    %72 = vector.broadcast %71 : vector<16x1xf32> to vector<16x128xf32>
    %73 = arith.select %10, %70, %72 : vector<16x128xi1>, vector<16x128xf32>
    %74 = vector.shape_cast %41 : vector<16x1xf32> to vector<16x1xf32>
    %75 = vector.broadcast %74 : vector<16x1xf32> to vector<16x128xf32>
    %76 = vector.shape_cast %40 : vector<16x1xf32> to vector<16x1xf32>
    %77 = vector.broadcast %76 : vector<16x1xf32> to vector<16x128xf32>
    %78 = arith.select %10, %75, %77 : vector<16x128xi1>, vector<16x128xf32>
    %79 = vector.shape_cast %43 : vector<16x1xf32> to vector<16x1xf32>
    %80 = vector.broadcast %79 : vector<16x1xf32> to vector<16x128xf32>
    %81 = vector.shape_cast %42 : vector<16x1xf32> to vector<16x1xf32>
    %82 = vector.broadcast %81 : vector<16x1xf32> to vector<16x128xf32>
    %83 = arith.select %10, %80, %82 : vector<16x128xi1>, vector<16x128xf32>
    %84 = arith.select %14, %53, %48 : vector<16x128xi1>, vector<16x128xf32>
    %85 = arith.select %14, %63, %58 : vector<16x128xi1>, vector<16x128xf32>
    %86 = arith.select %14, %73, %68 : vector<16x128xi1>, vector<16x128xf32>
    %87 = arith.select %14, %83, %78 : vector<16x128xi1>, vector<16x128xf32>
    %88 = arith.select %19, %85, %84 : vector<16x128xi1>, vector<16x128xf32>
    %89 = arith.select %19, %87, %86 : vector<16x128xi1>, vector<16x128xf32>
    %90 = arith.select %24, %89, %88 : vector<16x128xi1>, vector<16x128xf32>
    %91 = arith.mulf %26, %90 : vector<16x128xf32>
    %c0_13 = arith.constant 0 : index
    %c0_14 = arith.constant 0 : index
    %c0_15 = arith.constant 0 : index
    %92 = vector.load %arg6[%c0_13, %c0_14, %c0_15] : memref<1x16x128xf32, #tpu.memory_space<vmem>>, vector<1x16x128xf32>
    %93 = vector.shape_cast %92 : vector<1x16x128xf32> to vector<16x128xf32>
    %94 = vector.shape_cast %91 : vector<16x128xf32> to vector<1x16x128xf32>
    tpu.vector_store %arg6[%c0_13, %c0_14, %c0_15], %94 {strides = array<i32>} : memref<1x16x128xf32, #tpu.memory_space<vmem>>, vector<1x16x128xf32>,
    return
  }
  func.func @transform_0(%arg0: i32, %arg1: i32) -> (i32, i32, i32) {
    %c0_i32 = arith.constant 0 : i32
    %c0_i32_0 = arith.constant 0 : i32
    return %arg0, %c0_i32, %arg1 : i32, i32, i32
  }
  func.func @transform_1(%arg0: i32, %arg1: i32) -> (i32, i32) {
    %c0_i32 = arith.constant 0 : i32
    %c0_i32_0 = arith.constant 0 : i32
    %c0_i32_1 = arith.constant 0 : i32
    return %c0_i32, %c0_i32_0 : i32, i32
  }
  func.func @transform_2(%arg0: i32, %arg1: i32) -> (i32, i32, i32) {
    %c0_i32 = arith.constant 0 : i32
    %c0_i32_0 = arith.constant 0 : i32
    %c0_i32_1 = arith.constant 0 : i32
    return %arg0, %c0_i32, %c0_i32_0 : i32, i32, i32
  }
  func.func @transform_3(%arg0: i32, %arg1: i32) -> (i32, i32) {
    %c0_i32 = arith.constant 0 : i32
    %c0_i32_0 = arith.constant 0 : i32
    %c0_i32_1 = arith.constant 0 : i32
    return %c0_i32, %c0_i32_0 : i32, i32
  }
  func.func @transform_4(%arg0: i32, %arg1: i32) -> (i32, i32, i32) {
    %c0_i32 = arith.constant 0 : i32
    %c0_i32_0 = arith.constant 0 : i32
    return %arg0, %c0_i32, %arg1 : i32, i32, i32
  }
}

</mosaic_0001>

<bundles_post_ra>
// kernel: tpu_custom_call.1
= control target key start
LH: loop header
LB: loop body
LE: loop exit
PB: predicated region body
PF: predicated region fallthrough
CT: control target
= control target key end

     0   :  { %9 = vsyncpa [#allocation3], 0  ;;  %s1211_s0 = inlined_call_operand.vmem [shape: f32[2,4,128], index: 0, kind: input, shape index: {}]   ;;  %s1212_s1 = inlined_call_operand.vmem [shape: f32[64,4], index: 1, kind: input, shape index: {}]   ;;  %s1213_s2 = inlined_call_operand.vmem [shape: f32[2,64,1], index: 2, kind: input, shape index: {}]   ;;  %s1214_s3 = inlined_call_operand.vmem [shape: f32[16,16], index: 3, kind: input, shape index: {}]   ;;  %s1215_s4 = inlined_call_operand.hbm [shape: f32[2,16,128], index: 4, kind: output, shape index: {}]  }
   0x1   :  { %11 = vsyncpa [#allocation3 + $0x1], 0  ;;  %s923_s15 = smov 0   ;;  %s925_s16 = smov 0  }
   0x2   :  { %s927_s17 = smov 0   ;;  %s929_s18 = smov 0  }
   0x3   :  { %s931_s19 = smov 0   ;;  %s933_s20 = smov 0  }
   0x4 LB: > { %s665_s21 = sadd.s32 4294967295, %s878_s20   ;;  %s666_s22 = sadd.s32 4294967294, %s878_s20   ;;  %s878_s20 = sphi %s933_s20, %s17_s20   ;;  %s874_s19 = sphi %s931_s19, %s1222_s19   ;;  %s870_s18 = sphi %s929_s18, %s1221_s18   ;;  %s866_s17 = sphi %s927_s17, %s1220_s17   ;;  %s862_s16 = sphi %s925_s16, %s1219_s16   ;;  %s858_s15 = sphi %s923_s15, %s1218_s15  }
   0x5   : > { %s29_s23 = sadd.s32 1, %s874_s19  ;;  %s134_s24 = sadd.s32 1, %s866_s17 }
   0x6   : > { %p31_p0 = scmp.ge.s32.totalorder %s29_s23, 2  ;;  %p144_p1 = scmp.ne.s32.totalorder %s866_s17, %s862_s16 }
   0x7   : > { %p145_p2 = scmp.eq.s32.totalorder %s665_s21, 1  ;;  %p150_p3 = scmp.ne.s32.totalorder %s862_s16, %s858_s15 }
   0x8   : > { %s1224_s23 = smov (%p31_p0, %s29_s23), 0  ;;  %p151_p5 = scmp.eq.s32.totalorder %s666_s22, 1 }
   0x9   : > { %p963_p4 = por %p145_p2, %p144_p1  ;;  %s129_s26 = ssub.s32 %s874_s19, %s1224_s23 }
   0xa   : > { %p669_p6 = scmp.ge.s32.totalorder %s878_s20, 1  ;;  %p132_p7 = scmp.eq.s32.totalorder %s129_s26, 0 }
   0xb   : > { %p970_p8 = por %p151_p5, %p150_p3  ;;  %p193_p9 = scmp.lt.s32.totalorder %s878_s20, 3 }
   0xc   : > { %s976_s28 = scalar_select %p132_p7, %s866_s17, %s134_s24  }
   0xd   : > { %p194_p10 = pnand %p669_p6, %p193_p9 }
   0xe   : > { %p226_p11 = scmp.lt.s32.totalorder (!%p194_p10), %s870_s18, 1  ;;  %s820_s14 = scalar_lea.hbm (!%p194_p10), %s1215_s4, 32 }
   0xf   : > { %197 = sbr.rel (%p194_p10) target bundleno = 273 (0x111), region = 36 }
  0x14   : > { %v880_v0 = vmov 0   ;;  %s227_s29 = scalar_select %p226_p11, %s870_s18, 1  ;;  %vm272_vm0 = vcmask 1043456   ;;  %v238_v5 = vld [vmem:[%s1212_s1] sm:$0xff]  ;;  %vm247_vm1 = vcmask 31744   ;;  %v240_v6 = vld [vmem:[%s1212_s1 + $0x10] sm:$0xff] }
  0x15   : > { %768 = vset.pattern.permute.xlu2 %v880_v0  ;;  %767 = vset.pattern.permute.xlu1 %v880_v0  ;;  %v242_v7 = vld [vmem:[%s1212_s1 + $0x20] sm:$0xff]  ;;  %v244_v8 = vld [vmem:[%s1212_s1 + $0x30] sm:$0xff]  ;;  %v239_v12 = vld [vmem:[%s1212_s1 + $0x8] sm:$0xff]  ;;  %v881_v19 = vmov 1   ;;  %v882_v21 = vmov 3   ;;  %v883_v22 = vmov 2  }
  0x16   : > { %766 = vset.pattern.permute.xlu0 %v880_v0  ;;  %s688_s30 = sshll.u32 %s227_s29, 6  ;;  %s671_s5 = sshll.u32 %s227_s29, 2  ;;  %v241_v13 = vld [vmem:[%s1212_s1 + $0x18] sm:$0xff]  ;;  %v243_v14 = vld [vmem:[%s1212_s1 + $0x28] sm:$0xff]  ;;  %v1035_v18 = vld [vmem:[%s1214_s3] sm:$0xff]  ;;  %v884_v23 = vmov 5  }
  0x17   : > { %s983_s8 = scalar_lea.vmem %s1213_s2, %s688_s30  ;;  %s232_s11 = scalar_lea.vmem %s1211_s0, %s671_s5  ;;  %v245_v15 = vld [vmem:[%s1212_s1 + $0x38] sm:$0xff]  ;;  %v1041_v20 = vld [vmem:[%s1214_s3 + $0x8] sm:$0xff]  ;;  %v885_v24 = vmov 4   ;;  %v886_v25 = vmov 9   ;;  %v887_v26 = vmov 7   ;;  %v888_v27 = vmov 11  }
  0x18   : > { %v321_v1 = vld [vmem:[%s983_s8 + $0x20] sm:$0xff]  ;;  %v319_v2 = vld [vmem:[%s983_s8 + $0x10] sm:$0xff]  ;;  %v322_v9 = vld [vmem:[%s983_s8 + $0x28] sm:$0xff]  ;;  %v889_v28 = vmov 6   ;;  %v890_v29 = vmov 12   ;;  %v891_v30 = vmov 8  }
  0x19   : > { %v317_v3 = vld [vmem:[%s983_s8] sm:$0xff]  ;;  %347 = vperm.xlu2 %768, %v321_v1   ;;  %337 = vperm.xlu1 %767, %v319_v2   ;;  %v320_v10 = vld [vmem:[%s983_s8 + $0x18] sm:$0xff]  ;;  %v318_v11 = vld [vmem:[%s983_s8 + $0x8] sm:$0xff]  ;;  %v892_v32 = vmov 14   ;;  %v893_v33 = vmov 10   ;;  %v894_v35 = vmov 13  }
  0x1a   : > { %v246_v4 = vld [vmem:[%s232_s11] sm:$0xf]  ;;  %327 = vperm.xlu0 %766, %v317_v3   ;;  %v324_v16 = vld [vmem:[%s983_s8 + $0x38] sm:$0xff]  ;;  %v323_v17 = vld [vmem:[%s983_s8 + $0x30] sm:$0xff]  ;;  %v895_v38 = vmov 15   ;;  %s223_s8 = sand.u32 1, %s862_s16  }
  0x1b   : > { %674 = vmatpush.msk.msra.mxu0 %vm272_vm0, %v246_v4  ;;  %690 = vmatpush.msk.msra.mxu1 %vm272_vm0, %v246_v4  ;;  %s670_s24 = sshll.u32 %s223_s8, 4  ;;  %s689_s29 = sshll.u32 %s870_s18, 4 }
  0x1c   : > { %691 = vmatpush.msk.msra.mxu2 %vm272_vm0, %v246_v4  ;;  %692 = vmatpush.msk.msra.mxu3 %vm272_vm0, %v246_v4  ;;  %s225_s26 = scalar_lea.vmem [#allocation2], %s670_s24  ;;  %s574_s6 = scalar_lea.hbm %s1215_s4, %s689_s29 }
  0x1d   : > { %675 = vmatmul.msk.f32.vlgmr.msra.gmra.mxu0 %vm247_vm1, %v238_v5  ;;  %677 = vmatmul.msk.f32.vlgmr.msra.gmra.mxu1 %vm247_vm1, %v240_v6  ;;  %s575_s7 = sshll.u32 %s225_s26, 4  ;;  %s577_s9 = sshll.u32 %s574_s6, 4  ;;  %s576_s7 = int_to_ptr.vmem [resolvable:$true] %s575_s7  ;;  %s578_s9 = int_to_ptr.hbm [resolvable:$true] %s577_s9 }
  0x1e   : > { %679 = vmatmul.msk.f32.vlgmr.msra.gmra.mxu2 %vm247_vm1, %v242_v7  ;;  %681 = vmatmul.msk.f32.vlgmr.msra.gmra.mxu3 %vm247_vm1, %v244_v8  ;;  %s562_s18 = scalar_lea.sflag [#allocation3], %s223_s8  ;;  %s814_s10 = sshra.s32 %s578_s9, 4  ;;  %s815_s10 = int_to_ptr.hbm [resolvable:$true] %s814_s10 }
  0x1f   : > { %s816_s11 = scalar_lea.hbm %s815_s10, 16  ;;  %p821_p1 = scmp.lt.s32.totalorder %s815_s10, %s1215_s4 }
  0x20   : > { %p817_p12 = scmp.ne.s32.totalorder %s815_s10, %s816_s11  ;;  %p822_p2 = scmp.lt.s32.totalorder %s820_s14, %s816_s11 }
  0x21   : > { %352 = vperm.xlu2 %768, %v322_v9   ;;  %342 = vperm.xlu1 %767, %v320_v10  }
  0x22   : > { %332 = vperm.xlu0 %766, %v318_v11   ;;  %p818_p13 = pnand %p817_p12, %p963_p4  ;;  %p823_p3 = por %p822_p2, %p821_p1 }
  0x24   : > { %p819_p0 = pneg %p818_p13 }
  0x25   : > { %676 = vmatmul.msk.f32.gmra.mxu0 %vm247_vm1, %v239_v12  ;;  %678 = vmatmul.msk.f32.gmra.mxu1 %vm247_vm1, %v241_v13 }
  0x26   : > { %680 = vmatmul.msk.f32.gmra.mxu2 %vm247_vm1, %v243_v14  ;;  %682 = vmatmul.msk.f32.gmra.mxu3 %vm247_vm1, %v245_v15  ;;  %p824_p5 = pnand %p823_p3, %p819_p0 }
  0x29   : > { %769 = vset.pattern.permute.xlu2 %v881_v19  ;;  %362 = vperm.xlu1 %767, %v324_v16  }
  0x2a   : > { %357 = vperm.xlu0 %766, %v323_v17   ;;  %399 = vperm.xlu2 %769, %v1035_v18  }
  0x31   : > { %408 = vperm.xlu1 %767, %v1035_v18  }
  0x32   : > { %770 = vset.pattern.permute.xlu0 %v881_v19  ;;  %771 = vset.pattern.permute.xlu2 %v880_v0 }
  0x33   : > { %404 = vperm.xlu0 %770, %v1041_v20   ;;  %412 = vperm.xlu2 %771, %v1041_v20  }
  0x39   : > { %772 = vset.pattern.permute.xlu1 %v882_v21 }
  0x3a   : > { %418 = vperm.xlu1 %772, %v1035_v18  }
  0x3b   : > { %774 = vset.pattern.permute.xlu0 %v883_v22  ;;  %773 = vset.pattern.permute.xlu2 %v882_v21 }
  0x3c   : > { %426 = vperm.xlu0 %774, %v1035_v18   ;;  %422 = vperm.xlu2 %773, %v1041_v20  }
  0x42   : > { %775 = vset.pattern.permute.xlu1 %v883_v22 }
  0x43   : > { %430 = vperm.xlu1 %775, %v1041_v20  }
  0x44   : > { %776 = vset.pattern.permute.xlu2 %v884_v23  ;;  %779 = vset.pattern.permute.xlu0 %v885_v24 }
  0x45   : > { %436 = vperm.xlu2 %776, %v1035_v18   ;;  %448 = vperm.xlu0 %779, %v1041_v20  }
  0x4b   : > { %777 = vset.pattern.permute.xlu1 %v884_v23 }
  0x4c   : > { %440 = vperm.xlu1 %777, %v1041_v20  }
  0x4d   : > { %778 = vset.pattern.permute.xlu2 %v885_v24  ;;  %784 = vset.pattern.permute.xlu0 %v886_v25 }
  0x4e   : > { %444 = vperm.xlu2 %778, %v1035_v18   ;;  %472 = vperm.xlu0 %784, %v1035_v18  }
  0x54   : > { %780 = vset.pattern.permute.xlu1 %v887_v26 }
  0x55   : > { %454 = vperm.xlu1 %780, %v1035_v18  }
  0x56   : > { %781 = vset.pattern.permute.xlu2 %v887_v26  ;;  %789 = vset.pattern.permute.xlu0 %v888_v27 }
  0x57   : > { %458 = vperm.xlu2 %781, %v1041_v20   ;;  %494 = vperm.xlu0 %789, %v1041_v20  }
  0x5d   : > { %782 = vset.pattern.permute.xlu1 %v889_v28 }
  0x5e   : > { %462 = vperm.xlu1 %782, %v1035_v18  }
  0x5f   : > { %783 = vset.pattern.permute.xlu2 %v889_v28  ;;  %794 = vset.pattern.permute.xlu0 %v890_v29 }
  0x60   : > { %466 = vperm.xlu2 %783, %v1041_v20   ;;  %516 = vperm.xlu0 %794, %v1035_v18  }
  0x66   : > { %785 = vset.pattern.permute.xlu1 %v886_v25 }
  0x67   : > { %476 = vperm.xlu1 %785, %v1041_v20  }
  0x68   : > { %786 = vset.pattern.permute.xlu2 %v891_v30  ;;  %799 = vset.pattern.permute.xlu0 %v892_v32 }
  0x69   : > { %480 = vperm.xlu2 %786, %v1035_v18   ;;  %538 = vperm.xlu0 %799, %v1041_v20  }
  0x6f   : > { %787 = vset.pattern.permute.xlu1 %v891_v30 }
  0x70   : > { %484 = vperm.xlu1 %787, %v1041_v20  }
  0x71   : > { %788 = vset.pattern.permute.xlu2 %v888_v27 }
  0x72   : > { %490 = vperm.xlu2 %788, %v1035_v18  }
  0x73   : > { %v348_v31 = vpop.permute.xlu2 %347 }
  0x78   : > { %790 = vset.pattern.permute.xlu1 %v893_v33 }
  0x79   : > { %498 = vperm.xlu1 %790, %v1035_v18  }
  0x7a   : > { %791 = vset.pattern.permute.xlu2 %v893_v33 }
  0x7b   : > { %502 = vperm.xlu2 %791, %v1041_v20   ;;  %v353_v34 = vpop.permute.xlu2 %352 }
  0x81   : > { %792 = vset.pattern.permute.xlu1 %v894_v35 }
  0x82   : > { %508 = vperm.xlu1 %792, %v1035_v18  }
  0x83   : > { %793 = vset.pattern.permute.xlu2 %v894_v35 }
  0x84   : > { %512 = vperm.xlu2 %793, %v1041_v20   ;;  %v400_v36 = vpop.permute.xlu2 %399 }
  0x8a   : > { %795 = vset.pattern.permute.xlu1 %v890_v29 }
  0x8b   : > { %520 = vperm.xlu1 %795, %v1041_v20   ;;  %v338_v37 = vpop.permute.xlu1 %337 }
  0x8c   : > { %796 = vset.pattern.permute.xlu2 %v895_v38  ;;  %v328_v39 = vpop.permute.xlu0 %327 }
  0x8d   : > { %526 = vperm.xlu2 %796, %v1035_v18   ;;  %v413_v40 = vpop.permute.xlu2 %412 }
  0x93   : > { %797 = vset.pattern.permute.xlu1 %v895_v38  ;;  %v343_v41 = vpop.permute.xlu1 %342 }
  0x94   : > { %530 = vperm.xlu1 %797, %v1041_v20   ;;  %v333_v42 = vpop.permute.xlu0 %332 }
  0x95   : > { %798 = vset.pattern.permute.xlu2 %v892_v32 }
  0x96   : > { %534 = vperm.xlu2 %798, %v1035_v18   ;;  %v423_v43 = vpop.permute.xlu2 %422 }
  0x9a   : > { %v293_v44 = vpop.f32.mrf.mxu0  ;;  %v299_v45 = vpop.f32.mrf.mxu1 }
  0x9b   : > { %v1074_v46 = vsub.f32 %v293_v44, %v328_v39  ;;  %v1076_v47 = vsub.f32 %v299_v45, %v338_v37  ;;  %v363_v48 = vpop.permute.xlu1 %362 }
  0x9c   : > { %v1078_v49 = vpop.permute.xlu0 %357 }
  0x9d   : > { %v375_v50 = vand.u32 2147483647, %v1074_v46  ;;  %v379_v51 = vand.u32 2147483647, %v1076_v47  ;;  %vm373_vm2 = vcmp.gt.f32.partialorder %v1074_v46, 0.0  ;;  %vm377_vm4 = vcmp.gt.f32.partialorder %v1076_v47, 0.0 }
  0x9f   : > { %v437_v52 = vpop.permute.xlu2 %436  ;;  %v381_v59 = vmin.f32 %v375_v50, %v379_v51 }
  0xa1   : > { %v305_v53 = vpop.f32.mrf.mxu2  ;;  %v1084_v55 = vpop.f32.mrf.mxu3 }
  0xa2   : > { %v1082_v54 = vsub.f32 %v305_v53, %v348_v31  ;;  %v296_v56 = vpop.f32.mrf.mxu0  ;;  %v302_v58 = vpop.f32.mrf.mxu1 }
  0xa3   : > { %v1087_v57 = vsub.f32 %v296_v56, %v333_v42  ;;  %v1090_v61 = vsub.f32 %v302_v58, %v343_v41  ;;  %v409_v62 = vpop.permute.xlu1 %408 }
  0xa4   : > { %v385_v60 = vand.u32 2147483647, %v1082_v54  ;;  %v415_v2 = vsel %vm373_vm2, %v400_v36, %v409_v62  ;;  %vm383_vm7 = vcmp.gt.f32.partialorder %v1082_v54, 0.0 }
  0xa5   : > { %vm374_vm3 = vcmp.gt.f32.partialorder %v1087_v57, 0.0  ;;  %v376_v63 = vand.u32 2147483647, %v1087_v57  ;;  %v380_v1 = vand.u32 2147483647, %v1090_v61  ;;  %v405_v3 = vpop.permute.xlu0 %404  ;;  %vm378_vm5 = vcmp.gt.f32.partialorder %v1090_v61, 0.0 }
  0xa6   : > { %v1094_v0 = vmin.f32 %v381_v59, %v385_v60  ;;  %v416_v4 = vsel %vm374_vm3, %v405_v3, %v413_v40 }
  0xa7   : > { %v382_v5 = vmin.f32 %v376_v63, %v380_v1 }
  0xa8   : > { %v445_v7 = vpop.permute.xlu2 %444 }
  0xa9   : > { %v308_v6 = vpop.f32.mrf.mxu2  ;;  %v314_v9 = vpop.f32.mrf.mxu3  ;;  %v451_v10 = vsel %vm373_vm2, %v437_v52, %v445_v7  ;;  %v371_v52 = vsub.f32 %v1084_v55, %v1078_v49 }
  0xaa   : > { %v1101_v8 = vsub.f32 %v308_v6, %v353_v34  ;;  %v1105_v11 = vsub.f32 %v314_v9, %v363_v48 }
  0xab   : > { %v391_v58 = vand.u32 2147483647, %v371_v52  ;;  %vm389_vm8 = vcmp.gt.f32.partialorder %v371_v52, 0.0 }
  0xac   : > { %v386_v12 = vand.u32 2147483647, %v1101_v8  ;;  %v419_v13 = vpop.permute.xlu1 %418  ;;  %v392_v15 = vand.u32 2147483647, %v1105_v11  ;;  %vm384_vm6 = vcmp.gt.f32.partialorder %v1101_v8, 0.0  ;;  %vm390_vm9 = vcmp.gt.f32.partialorder %v1105_v11, 0.0 }
  0xae   : > { %v388_v14 = vmin.f32 %v382_v5, %v386_v12  ;;  %v427_v16 = vpop.permute.xlu0 %426 }
  0xaf   : > { %v433_v18 = vsel %vm373_vm2, %v419_v13, %v427_v16 }
  0xb0   : > { %v1110_v17 = vmin.f32 %v388_v14, %v392_v15  ;;  %v543_v19 = vsel %vm377_vm4, %v433_v18, %v415_v2  ;;  %v393_v2 = vmin.f32 %v1094_v0, %v391_v58 }
  0xb1   : > { %v459_v20 = vpop.permute.xlu2 %458 }
  0xb5   : > { %v431_v21 = vpop.permute.xlu1 %430 }
  0xb6   : > { %v434_v22 = vsel %vm374_vm3, %v423_v43, %v431_v21 }
  0xb7   : > { %v544_v23 = vsel %vm378_vm5, %v434_v22, %v416_v4  ;;  %v449_v26 = vpop.permute.xlu0 %448 }
  0xba   : > { %v467_v24 = vpop.permute.xlu2 %466 }
  0xbb   : > { %v470_v25 = vsel %vm374_vm3, %v459_v20, %v467_v24 }
  0xbe   : > { %v441_v27 = vpop.permute.xlu1 %440 }
  0xbf   : > { %v452_v28 = vsel %vm374_vm3, %v441_v27, %v449_v26 }
  0xc0   : > { %v546_v29 = vsel %vm378_vm5, %v470_v25, %v452_v28  ;;  %v473_v39 = vpop.permute.xlu0 %472 }
  0xc1   : > { %v552_v30 = vsel %vm384_vm6, %v546_v29, %v544_v23 }
  0xc3   : > { %v481_v31 = vpop.permute.xlu2 %480 }
  0xc4   : > { %v487_v62 = vsel %vm373_vm2, %v473_v39, %v481_v31 }
  0xc7   : > { %v455_v32 = vpop.permute.xlu1 %454 }
  0xc9   : > { %v495_v42 = vpop.permute.xlu0 %494 }
  0xcc   : > { %v491_v33 = vpop.permute.xlu2 %490 }
  0xd0   : > { %v463_v34 = vpop.permute.xlu1 %462 }
  0xd1   : > { %v469_v35 = vsel %vm373_vm2, %v455_v32, %v463_v34 }
  0xd2   : > { %v545_v36 = vsel %vm377_vm4, %v469_v35, %v451_v10  ;;  %v517_v56 = vpop.permute.xlu0 %516 }
  0xd3   : > { %v551_v37 = vsel %vm383_vm7, %v545_v36, %v543_v19 }
  0xd5   : > { %v503_v38 = vpop.permute.xlu2 %502 }
  0xd6   : > { %v506_v44 = vsel %vm374_vm3, %v495_v42, %v503_v38 }
  0xd9   : > { %v477_v40 = vpop.permute.xlu1 %476 }
  0xdb   : > { %v539_v46 = vpop.permute.xlu0 %538 }
  0xde   : > { %v513_v41 = vpop.permute.xlu2 %512 }
  0xe2   : > { %v485_v43 = vpop.permute.xlu1 %484 }
  0xe3   : > { %v488_v45 = vsel %vm374_vm3, %v477_v40, %v485_v43 }
  0xe4   : > { %v548_v48 = vsel %vm378_vm5, %v506_v44, %v488_v45 }
  0xe7   : > { %v527_v50 = vpop.permute.xlu2 %526 }
  0xeb   : > { %v499_v51 = vpop.permute.xlu1 %498 }
  0xec   : > { %v505_v59 = vsel %vm373_vm2, %v491_v33, %v499_v51 }
  0xed   : > { %v547_v55 = vsel %vm377_vm4, %v505_v59, %v487_v62 }
  0xf0   : > { %v535_v53 = vpop.permute.xlu2 %534 }
  0xf1   : > { %v541_v63 = vsel %vm373_vm2, %v527_v50, %v535_v53 }
  0xf4   : > { %v509_v60 = vpop.permute.xlu1 %508 }
  0xf5   : > { %v523_v49 = vsel %vm373_vm2, %v509_v60, %v517_v56 }
  0xf6   : > { %v549_v1 = vsel %vm377_vm4, %v541_v63, %v523_v49 }
  0xf7   : > { %v553_v3 = vsel %vm383_vm7, %v549_v1, %v547_v55 }
  0xf8   : > { %v555_v4 = vsel %vm389_vm8, %v553_v3, %v551_v37 }
  0xf9   : > { %v557_v5 = vmul.f32 %v555_v4, %v393_v2 }
  0xfb   : > { %559 = vst [vmem:[%s225_s26] sm:$0xff] %v557_v5 }
  0xfd   : > { %v521_v6 = vpop.permute.xlu1 %520 }
  0xfe   : > { %v524_v7 = vsel %vm374_vm3, %v513_v41, %v521_v6 }
 0x106   : > { %v531_v47 = vpop.permute.xlu1 %530 }
 0x107   : > { %v542_v54 = vsel %vm374_vm3, %v531_v47, %v539_v46 }
 0x108   : > { %v550_v0 = vsel %vm378_vm5, %v542_v54, %v524_v7 }
 0x109   : > { %v554_v9 = vsel %vm384_vm6, %v550_v0, %v548_v48 }
 0x10a   : > { %v556_v10 = vsel %vm390_vm9, %v554_v9, %v552_v30 }
 0x10b   : > { %v558_v12 = vmul.f32 %v556_v10, %v1110_v17 }
 0x10d   : > { %560 = vst [vmem:[%s225_s26 + $0x8] sm:$0xff] %v558_v12 }
 0x10e   : > { %827 = shalt.err (!%p824_p5)
}
 0x10f   : > { %s896_s8 = smov 128   ;;  %s897_s24 = smov 8  }
 0x110   : > { %693 = dma.vmem_to_hbm [thread:$0]  (%p963_p4), %s576_s7, 256, %s578_s9, %s562_s18, %s896_s8, %s896_s8, %s897_s24  }
 0x111 PF: > { %p699_p6 = scmp.ge.s32.totalorder %s878_s20, 2  ;;  %s592_s26 = sand.u32 1, %s858_s15  }
 0x112   : > { %s593_s29 = scalar_lea.sflag [#allocation3], %s592_s26 }
 0x113   : > { %p696_p7 = pnand %p699_p6, %p970_p8 }
 0x115   : > { %p697_p9 = pneg %p696_p7 }
 0x117   : > { %853 = dma.done.wait (%p697_p9), %s593_s29, 256  }
 0x118   : > { %855 = vsyncadd (%p697_p9), %s593_s29, 4294967040  ;;  %s17_s20 = sadd.s32 1, %s878_s20   ;;  %s1218_s15 = smov %s862_s16 }
 0x119   : > { %p14_p10 = scmp.ge.s32.totalorder %s17_s20, 4   ;;  %s1219_s16 = smov %s866_s17 }
 0x11a   : > { %s1220_s17 = smov %s976_s28  ;;  %s1221_s18 = smov %s874_s19 }
 0x11b   : > { %s1222_s19 = smov %s1224_s23  ;;  %16 = sbr.rel (!%p14_p10) target bundleno = 4 (0x4), region = 74 }
 0x120   :  { %599 = vsyncpa [#allocation3], 1 }
 0x121   :  { %601 = vsyncpa [#allocation3 + $0x1], 1 }

</bundles_post_ra>
